<compile_context>
chip_gen: v7x
topology: tpu7x:2x2x1
jax: 0.10.0
libtpu: 0.0.40
codegen_flags: <defaults>
</compile_context>

<pallas_src>
import jax
import jax.numpy as jnp
from jax import lax
from jax.experimental import pallas as pl
from jax.experimental.pallas import tpu as pltpu


def _make_kernel(tb, td, d_total, need_d_mask):
    def linear_kernel(x_ref, w_ref, b_ref, o_ref):
        # x_ref: (tb, td) f32  -- batch on sublanes, feature on lanes
        # w_ref: (1, td)  f32  -- native torch layout, broadcasts over sublanes
        # b_ref: (1, 1)   f32  -- SMEM scalar
        # o_ref: (tb, 1)  f32  -- resident accumulator across the D grid axis
        k = pl.program_id(1)

        @pl.when(k == 0)
        def _():
            o_ref[...] = jnp.zeros_like(o_ref)

        prod = x_ref[...] * w_ref[...]
        if need_d_mask:
            # Ragged D edge: zero out lanes past the true feature count so
            # garbage in the padded edge block cannot corrupt the reduction.
            lane = lax.broadcasted_iota(jnp.int32, (tb, td), 1)
            prod = jnp.where(k * td + lane < d_total, prod, 0.0)

        o_ref[...] += jnp.sum(prod, axis=-1, keepdims=True)

        @pl.when(k == pl.num_programs(1) - 1)
        def _():
            o_ref[...] += b_ref[0, 0]

    return linear_kernel


def _choose_tiles(B, D):
    """Pick (tb, td) so the x tile is ~4 MiB (<=12 MiB) and sublane/lane aligned."""
    TARGET = 4 << 20   # ~4 MiB x tile -> ~8 MiB double-buffered
    MAX = 12 << 20     # <=24 MiB double-buffered: fits v7x VMEM with headroom
    b_ceil = max(8, pl.cdiv(B, 8) * 8)
    row_bytes = 4 * D

    # Prefer a full-D tile (no ragged-D masking, single reduction step).
    if row_bytes <= TARGET:
        tb = max(8, (TARGET // row_bytes) // 8 * 8)
    else:
        tb = 8
    tb = min(tb, b_ceil)
    if tb * row_bytes <= MAX:
        # v7x megacore: produce >=2 batch tiles when the batch allows it.
        if tb >= b_ceil and b_ceil > 8:
            tb = max(8, pl.cdiv(pl.cdiv(b_ceil, 2), 8) * 8)
        return tb, D

    # Very large D: also tile the reduction axis.
    tb = min(b_ceil, 256)
    td = max(128, (TARGET // (4 * tb)) // 128 * 128)
    td = min(td, pl.cdiv(D, 128) * 128)
    return tb, td


def simple_nn_forward(x, weight, bias):
    """y = x @ W^T + b  (torch nn.Linear(input_size, 1) forward).

    x      : (B, D) float32
    weight : (1, D) float32  (torch nn.Linear .weight layout)
    bias   : (1,)   float32  (torch nn.Linear .bias layout)
    returns: (B, 1) float32
    """
    B, D = x.shape
    x = x.astype(jnp.float32)
    w = weight.astype(jnp.float32).reshape(1, D)     # native lane-dense layout
    b = bias.astype(jnp.float32).reshape(1, 1)       # SMEM scalar

    tb, td = _choose_tiles(B, D)
    nb = pl.cdiv(B, tb)
    nd = pl.cdiv(D, td)
    need_d_mask = (D % td) != 0

    out = pl.pallas_call(
        _make_kernel(tb, td, D, need_d_mask),
        out_shape=jax.ShapeDtypeStruct((B, 1), jnp.float32),
        grid_spec=pltpu.PrefetchScalarGridSpec(
            num_scalar_prefetch=0,
            grid=(nb, nd),
            in_specs=[
                pl.BlockSpec((tb, td), lambda i, k: (i, k)),           # x tile (VMEM)
                pl.BlockSpec((1, td), lambda i, k: (0, k)),            # weight row (VMEM)
                pl.BlockSpec(memory_space=pltpu.MemorySpace.SMEM),     # bias scalar (SMEM)
            ],
            out_specs=pl.BlockSpec((tb, 1), lambda i, k: (i, 0)),      # accumulator tile
        ),
        compiler_params=pltpu.CompilerParams(
            dimension_semantics=("parallel", "arbitrary"),
            vmem_limit_bytes=48 << 20,
        ),
    )(x, w, b)

    return out


if __name__ == "__main__":
    key = jax.random.PRNGKey(0)

    # Case 1: the module's nominal small shape.
    batch, input_size = 8, 32
    kx, kw, kb, key = jax.random.split(key, 4)
    x = jax.random.normal(kx, (batch, input_size), dtype=jnp.float32)
    weight = jax.random.normal(kw, (1, input_size), dtype=jnp.float32) * 0.1
    bias = jax.random.normal(kb, (1,), dtype=jnp.float32) * 0.1

    out = jax.block_until_ready(simple_nn_forward(x, weight, bias))
    ref = x @ weight.T + bias[None, :]
    assert out.shape == (batch, 1)
    assert jnp.allclose(out, ref, atol=1e-5, rtol=1e-5)

    # Case 2: ragged batch edge (B not a multiple of the tile) to exercise
    # multi-tile grid + Pallas partial-block handling.
    batch2, input_size2 = 50, 40
    kx2, kw2, kb2, key = jax.random.split(key, 4)
    x2 = jax.random.normal(kx2, (batch2, input_size2), dtype=jnp.float32)
    weight2 = jax.random.normal(kw2, (1, input_size2), dtype=jnp.float32) * 0.1
    bias2 = jax.random.normal(kb2, (1,), dtype=jnp.float32) * 0.1

    out2 = jax.block_until_ready(simple_nn_forward(x2, weight2, bias2))
    ref2 = x2 @ weight2.T + bias2[None, :]
    assert out2.shape == (batch2, 1)
    assert jnp.allclose(out2, ref2, atol=1e-5, rtol=1e-5)

    print("KERNEL_OK")
</pallas_src>

<mosaic_0001>
module attributes {stable_mosaic.version = 11 : i64} {
  func.func @linear_kernel(%arg0: i32, %arg1: i32, %arg2: memref<8x32xf32, #tpu.memory_space<vmem>>, %arg3: memref<1x32xf32, #tpu.memory_space<vmem>>, %arg4: memref<1x1xf32, #tpu.memory_space<smem>>, %arg5: memref<8x1xf32, #tpu.memory_space<vmem>>) attributes {dimension_semantics = [#tpu.dimension_semantics<parallel>, #tpu.dimension_semantics<arbitrary>], iteration_bounds = array<i64: 1, 1>, scalar_prefetch = 0 : i64, scratch_operands = 0 : i64, tpu.core_type = #tpu.core_type<tc>, window_params = [{transform_indices = @transform_0, window_bounds = array<i64: 8, 32>}, {transform_indices = @transform_1, window_bounds = array<i64: 1, 32>}, {transform_indices = @transform_2, window_bounds = array<i64: 1, 1>}, {transform_indices = @transform_3, window_bounds = array<i64: 8, 1>}]} {
    %c0_i32 = arith.constant 0 : i32
    %0 = arith.cmpi eq, %arg1, %c0_i32 : i32
    %1 = arith.extui %0 : i1 to i32
    %c0_i32_0 = arith.constant 0 : i32
    %2 = arith.cmpi ne, %1, %c0_i32_0 : i32
    scf.if %2 {
      %cst_10 = arith.constant 0.000000e+00 : f32
      %15 = vector.broadcast %cst_10 : f32 to vector<8x1xf32>
      %c0_11 = arith.constant 0 : index
      %c0_12 = arith.constant 0 : index
      %16 = vector.load %arg5[%c0_11, %c0_12] : memref<8x1xf32, #tpu.memory_space<vmem>>, vector<8x1xf32>
      tpu.vector_store %arg5[%c0_11, %c0_12], %15 {strides = array<i32>} : memref<8x1xf32, #tpu.memory_space<vmem>>, vector<8x1xf32>,
    } else {
    }
    %c0 = arith.constant 0 : index
    %c0_1 = arith.constant 0 : index
    %3 = vector.load %arg2[%c0, %c0_1] : memref<8x32xf32, #tpu.memory_space<vmem>>, vector<8x32xf32>
    %c0_2 = arith.constant 0 : index
    %c0_3 = arith.constant 0 : index
    %4 = vector.load %arg3[%c0_2, %c0_3] : memref<1x32xf32, #tpu.memory_space<vmem>>, vector<1x32xf32>
    %5 = vector.broadcast %4 : vector<1x32xf32> to vector<8x32xf32>
    %6 = arith.mulf %3, %5 : vector<8x32xf32>
    %c0_4 = arith.constant 0 : index
    %c0_5 = arith.constant 0 : index
    %7 = vector.load %arg5[%c0_4, %c0_5] : memref<8x1xf32, #tpu.memory_space<vmem>>, vector<8x1xf32>
    %cst = arith.constant dense<0.000000e+00> : vector<8xf32>
    %8 = vector.multi_reduction <add>, %6, %cst [1] : vector<8x32xf32> to vector<8xf32>
    %9 = vector.shape_cast %8 : vector<8xf32> to vector<8x1xf32>
    %10 = arith.addf %7, %9 : vector<8x1xf32>
    %c0_6 = arith.constant 0 : index
    %c0_7 = arith.constant 0 : index
    %11 = vector.load %arg5[%c0_6, %c0_7] : memref<8x1xf32, #tpu.memory_space<vmem>>, vector<8x1xf32>
    tpu.vector_store %arg5[%c0_6, %c0_7], %10 {strides = array<i32>} : memref<8x1xf32, #tpu.memory_space<vmem>>, vector<8x1xf32>,
    %c0_i32_8 = arith.constant 0 : i32
    %12 = arith.cmpi eq, %arg1, %c0_i32_8 : i32
    %13 = arith.extui %12 : i1 to i32
    %c0_i32_9 = arith.constant 0 : i32
    %14 = arith.cmpi ne, %13, %c0_i32_9 : i32
    scf.if %14 {
      %c0_10 = arith.constant 0 : index
      %c0_11 = arith.constant 0 : index
      %15 = vector.load %arg5[%c0_10, %c0_11] : memref<8x1xf32, #tpu.memory_space<vmem>>, vector<8x1xf32>
      %c0_12 = arith.constant 0 : index
      %c0_13 = arith.constant 0 : index
      %16 = memref.load %arg4[%c0_12, %c0_13] : memref<1x1xf32, #tpu.memory_space<smem>>
      %17 = vector.broadcast %16 : f32 to vector<8x1xf32>
      %18 = arith.addf %15, %17 : vector<8x1xf32>
      %c0_14 = arith.constant 0 : index
      %c0_15 = arith.constant 0 : index
      %19 = vector.load %arg5[%c0_14, %c0_15] : memref<8x1xf32, #tpu.memory_space<vmem>>, vector<8x1xf32>
      tpu.vector_store %arg5[%c0_14, %c0_15], %18 {strides = array<i32>} : memref<8x1xf32, #tpu.memory_space<vmem>>, vector<8x1xf32>,
    } else {
    }
    return
  }
  func.func @transform_0(%arg0: i32, %arg1: i32) -> (i32, i32) {
    %c0_i32 = arith.constant 0 : i32
    return %arg0, %arg1 : i32, i32
  }
  func.func @transform_1(%arg0: i32, %arg1: i32) -> (i32, i32) {
    %c0_i32 = arith.constant 0 : i32
    %c0_i32_0 = arith.constant 0 : i32
    return %c0_i32, %arg1 : i32, i32
  }
  func.func @transform_2(%arg0: i32, %arg1: i32) -> (i32, i32) {
    %c0_i32 = arith.constant 0 : i32
    %c0_i32_0 = arith.constant 0 : i32
    %c0_i32_1 = arith.constant 0 : i32
    return %c0_i32, %c0_i32_0 : i32, i32
  }
  func.func @transform_3(%arg0: i32, %arg1: i32) -> (i32, i32) {
    %c0_i32 = arith.constant 0 : i32
    %c0_i32_0 = arith.constant 0 : i32
    return %arg0, %c0_i32 : i32, i32
  }
}

</mosaic_0001>

<bundles_post_ra>
// kernel: tpu_custom_call.1
= control target key start
LH: loop header
LB: loop body
LE: loop exit
PB: predicated region body
PF: predicated region fallthrough
CT: control target
= control target key end

     0   :  { %9 = vsyncpa [#allocation4], 0  ;;  %s90_s12 = smov [#allocation3]   ;;  %s148_s0 = inlined_call_operand.hbm [shape: f32[8,32], index: 0, kind: input, shape index: {}]   ;;  %s149_s1 = inlined_call_operand.vmem [shape: f32[1,32], index: 1, kind: input, shape index: {}]   ;;  %s150_s2 = inlined_call_operand.<no memory space> [shape: f32[1,1], index: 2, kind: input, shape index: {}]   ;;  %s151_s3 = inlined_call_operand.vmem [shape: f32[8,1], index: 3, kind: output, shape index: {}]  }
   0x1   :  { %s16_s13 = sshll.u32 %s90_s12, 4  ;;  %s66_s16 = scalar_lea.hbm %s148_s0, 128  ;;  %s17_s13 = int_to_ptr.vmem [resolvable:$true] %s16_s13 }
   0x2   :  { %p67_p0 = scmp.ne.s32.totalorder %s148_s0, %s66_s16  ;;  %p70_p1 = scmp.lt.u32.totalorder %s66_s16, %s148_s0 }
   0x4   :  { %p72_p2 = pnand %p70_p1, %p67_p0 }
   0x6   :  { %75 = shalt.err (!%p72_p2)
}
   0x7   :  { %s76_s21 = scalar_lea.vmem %s17_s13, 128  ;;  %p81_p4 = scmp.lt.s32.totalorder %s17_s13, %s17_s13 }
   0x8   :  { %p77_p3 = scmp.ne.s32.totalorder %s17_s13, %s76_s21  ;;  %p82_p5 = scmp.lt.s32.totalorder %s76_s21, %s76_s21 }
   0xa   :  { %p83_p6 = por %p82_p5, %p81_p4 }
   0xc   :  { %p84_p7 = pnand %p83_p6, %p77_p3 }
   0xe   :  { %87 = shalt.err (!%p84_p7)
}
   0xf   :  { %19 = dma.hbm_to_vmem [thread:$0]  %s148_s0, 128, %s17_s13, [#allocation4]  }
  0x10   :  { %88 = dma.done.wait [#allocation4], 128  }
  0x11   :  { %89 = vsyncadd [#allocation4], 4294967168  ;;  %vm31_vm0 = vcmask 7168   ;;  %v91_v0 = vmov 0.0   ;;  %v33_v1 = vld [vmem:[#allocation3] sm:$0xff]  ;;  %vm43_vm1 = vcmask 261120   ;;  %v55_v8 = vstv %s150_s2 }
  0x12   :  { %32 = vst.msk [vmem:[%s151_s3] sm:$0xff] %vm31_vm0, %v91_v0  ;;  %v63_v2 = vld [vmem:[%s149_s1] ss:$0 sm:$0xff] }
  0x13   :  { %v41_v3 = vmul.f32 %v63_v2, %v33_v1 }
  0x15   :  { %v44_v4 = vsel %vm43_vm1, %v41_v3, 0.0 }
  0x16   :  { %45 = vadd.xlane.f32.xlu0 %v44_v4 }
  0x19   :  { %v42_v5 = vld [vmem:[%s151_s3] sm:$0xff] }
  0xa3   :  { %v46_v6 = vpop.xlane.xlu0 %45 }
  0xa4   :  { %v47_v7 = vadd.f32 %v46_v6, %v42_v5 }
  0xa6   :  { %49 = vst.msk [vmem:[%s151_s3] sm:$0xff] %vm31_vm0, %v47_v7 }
  0xad   :  { %v53_v9 = vld [vmem:[%s151_s3] sm:$0xff] }
  0xae   :  { %v56_v10 = vadd.f32 %v55_v8, %v53_v9 }
  0xb0   :  { %57 = vst.msk [vmem:[%s151_s3] sm:$0xff] %vm31_vm0, %v56_v10 }
  0xb1   :  { %62 = vsyncpa [#allocation4], 1 }

</bundles_post_ra>
